<compile_context>
chip_gen: v5e
topology: v5e:2x2
jax: 0.10.0
libtpu: 0.0.40
codegen_flags: <defaults>
</compile_context>

<pallas_src>
import functools

import jax
import jax.numpy as jnp
from jax.experimental import pallas as pl
from jax.experimental.pallas import tpu as pltpu

_LANE = 128      # TPU lane width: keep output stores lane-dense
_SUBLANE = 8     # sublane granularity for the batch tile
_MAX_TB = 512    # batch-tile rows once the batch is large (~85% HBM roofline)


def _round_up(n, m):
    return (n + m - 1) // m * m


def _mlp_kernel(x_ref, w1_ref, b1_ref, w2_ref, b2_ref, o_ref):
    """Fused sigmoid(relu(x @ W1 + b1) @ W2 + b2) on one batch tile."""
    # Layer 1: bf16 MXU inputs, f32 accumulation, f32 epilogue.
    h = jnp.dot(x_ref[...], w1_ref[...], preferred_element_type=jnp.float32)
    h = jnp.maximum(h + b1_ref[...], 0.0)
    # Layer 2: back to bf16 for the MXU, f32 accumulation + f32 sigmoid.
    o = jnp.dot(h.astype(w2_ref.dtype), w2_ref[...],
                preferred_element_type=jnp.float32)
    o = o + b2_ref[...]
    o_ref[...] = jax.nn.sigmoid(o).astype(o_ref.dtype)


def prepare_params(w1, b1, w2, b2):
    """One-time parameter prep (do NOT redo per forward call).

    PyTorch Linear stores weight as (out, in); pre-transpose to (in, out),
    pad the output dim up to a 128-lane tile (zeros in the padded columns,
    sliced away after the kernel) and pre-cast matmul operands to bf16.
    Biases stay f32 (the epilogue runs in f32).
    """
    n_hidden, n_feature = w1.shape
    n_output = w2.shape[0]
    o_pad = max(_round_up(n_output, _LANE), _LANE)

    w1_t = w1.T.astype(jnp.bfloat16)                               # (F, H)
    b1_r = b1.reshape(1, n_hidden).astype(jnp.float32)             # (1, H)

    w2_t = jnp.zeros((n_hidden, o_pad), jnp.bfloat16)              # (H, Opad)
    w2_t = w2_t.at[:, :n_output].set(w2.T.astype(jnp.bfloat16))
    b2_r = jnp.zeros((1, o_pad), jnp.float32)                      # (1, Opad)
    b2_r = b2_r.at[:, :n_output].set(b2.astype(jnp.float32))
    return w1_t, b1_r, w2_t, b2_r, n_output


@functools.partial(jax.jit, static_argnames=("n_output",))
def net_forward(x, w1_t, b1_r, w2_t, b2_r, *, n_output):
    """x: (B, F) f32/bf16; params from prepare_params(). Returns (B, n_output) f32."""
    B, F = x.shape
    H = w1_t.shape[1]
    o_pad = w2_t.shape[1]

    # Batch tiling: large tiles for pipelining once the batch is big; the
    # tile is always a multiple of 8 sublanes, batch padded up to the tile.
    tb = min(_MAX_TB, _round_up(B, _SUBLANE))
    b_pad = _round_up(B, tb)

    x_bf16 = x.astype(jnp.bfloat16)
    if b_pad != B:
        x_bf16 = jnp.pad(x_bf16, ((0, b_pad - B), (0, 0)))

    out = pl.pallas_call(
        _mlp_kernel,
        out_shape=jax.ShapeDtypeStruct((b_pad, o_pad), jnp.float32),
        grid=(b_pad // tb,),
        in_specs=[
            pl.BlockSpec((tb, F), lambda i: (i, 0)),       # streamed x tile
            pl.BlockSpec((F, H), lambda i: (0, 0)),        # VMEM-resident W1
            pl.BlockSpec((1, H), lambda i: (0, 0)),        # VMEM-resident b1
            pl.BlockSpec((H, o_pad), lambda i: (0, 0)),    # VMEM-resident W2
            pl.BlockSpec((1, o_pad), lambda i: (0, 0)),    # VMEM-resident b2
        ],
        out_specs=pl.BlockSpec((tb, o_pad), lambda i: (i, 0)),  # lane-dense store
        compiler_params=pltpu.CompilerParams(
            dimension_semantics=("parallel",)),            # v7x: shard over 2 TCs
    )(x_bf16, w1_t, b1_r, w2_t, b2_r)

    return out[:B, :n_output]


def init_params(key, n_feature, n_hidden, n_output):
    """Deterministic synthetic init matching nn.Linear parameter shapes
    (PyTorch convention: weight is (out, in))."""
    k1, k2, k3, k4 = jax.random.split(key, 4)
    w1 = jax.random.normal(k1, (n_hidden, n_feature), jnp.float32) * 0.1
    b1 = jax.random.normal(k2, (n_hidden,), jnp.float32) * 0.1
    w2 = jax.random.normal(k3, (n_output, n_hidden), jnp.float32) * 0.1
    b2 = jax.random.normal(k4, (n_output,), jnp.float32) * 0.1
    return w1, b1, w2, b2


if __name__ == "__main__":
    n_feature, n_hidden, n_output = 16, 32, 4
    batch = 8

    key = jax.random.PRNGKey(0)
    kx, kp = jax.random.split(key)
    x = jax.random.normal(kx, (batch, n_feature), jnp.float32)
    w1, b1, w2, b2 = init_params(kp, n_feature, n_hidden, n_output)

    # One-time param prep (transpose / pad / bf16 cast), then the fused kernel.
    w1_t, b1_r, w2_t, b2_r, n_out = prepare_params(w1, b1, w2, b2)
    out = net_forward(x, w1_t, b1_r, w2_t, b2_r, n_output=n_out)
    out = jax.block_until_ready(out)

    # Reference in plain JAX f32 (same math as the PyTorch forward); bf16 MXU
    # inputs introduce ~1e-3-level differences, so use a loose tolerance.
    ref = jax.nn.sigmoid(jnp.maximum(x @ w1.T + b1, 0.0) @ w2.T + b2)
    assert out.shape == (batch, n_output)
    assert jnp.allclose(out, ref, atol=2e-2, rtol=2e-2), (
        f"max abs err = {jnp.max(jnp.abs(out - ref))}")

    print("KERNEL_OK")
</pallas_src>

<mosaic_0001>
module attributes {stable_mosaic.version = 11 : i64} {
  func.func @_mlp_kernel(%arg0: i32, %arg1: memref<8x16xbf16, #tpu.memory_space<vmem>>, %arg2: memref<16x32xbf16, #tpu.memory_space<vmem>>, %arg3: memref<1x32xf32, #tpu.memory_space<vmem>>, %arg4: memref<32x128xbf16, #tpu.memory_space<vmem>>, %arg5: memref<1x128xf32, #tpu.memory_space<vmem>>, %arg6: memref<8x128xf32, #tpu.memory_space<vmem>>) attributes {dimension_semantics = [#tpu.dimension_semantics<parallel>], iteration_bounds = array<i64: 1>, scalar_prefetch = 0 : i64, scratch_operands = 0 : i64, tpu.core_type = #tpu.core_type<tc>, window_params = [{transform_indices = @transform_0, window_bounds = array<i64: 8, 16>}, {pipeline_mode = #tpu.pipeline_mode<synchronous>, transform_indices = @transform_1, window_bounds = array<i64: 16, 32>}, {pipeline_mode = #tpu.pipeline_mode<synchronous>, transform_indices = @transform_2, window_bounds = array<i64: 1, 32>}, {pipeline_mode = #tpu.pipeline_mode<synchronous>, transform_indices = @transform_3, window_bounds = array<i64: 32, 128>}, {pipeline_mode = #tpu.pipeline_mode<synchronous>, transform_indices = @transform_4, window_bounds = array<i64: 1, 128>}, {transform_indices = @transform_5, window_bounds = array<i64: 8, 128>}]} {
    %c0 = arith.constant 0 : index
    %c0_0 = arith.constant 0 : index
    %0 = vector.load %arg1[%c0, %c0_0] : memref<8x16xbf16, #tpu.memory_space<vmem>>, vector<8x16xbf16>
    %c0_1 = arith.constant 0 : index
    %c0_2 = arith.constant 0 : index
    %1 = vector.load %arg2[%c0_1, %c0_2] : memref<16x32xbf16, #tpu.memory_space<vmem>>, vector<16x32xbf16>
    %cst = arith.constant dense<0.000000e+00> : vector<8x32xf32>
    %2 = tpu.matmul %0, %1, %cst {dimension_numbers = #tpu.dot_dimension_numbers<[1], [0], [0], [1], [0, 0, 1, 1], [], []>} : vector<8x16xbf16>, vector<16x32xbf16>, vector<8x32xf32> -> vector<8x32xf32>
    %c0_3 = arith.constant 0 : index
    %c0_4 = arith.constant 0 : index
    %3 = vector.load %arg3[%c0_3, %c0_4] : memref<1x32xf32, #tpu.memory_space<vmem>>, vector<1x32xf32>
    %4 = vector.broadcast %3 : vector<1x32xf32> to vector<8x32xf32>
    %5 = arith.addf %2, %4 : vector<8x32xf32>
    %cst_5 = arith.constant 0.000000e+00 : f32
    %6 = vector.broadcast %cst_5 : f32 to vector<8x32xf32>
    %7 = arith.maximumf %5, %6 : vector<8x32xf32>
    %8 = arith.truncf %7 : vector<8x32xf32> to vector<8x32xbf16>
    %c0_6 = arith.constant 0 : index
    %c0_7 = arith.constant 0 : index
    %9 = vector.load %arg4[%c0_6, %c0_7] : memref<32x128xbf16, #tpu.memory_space<vmem>>, vector<32x128xbf16>
    %cst_8 = arith.constant dense<0.000000e+00> : vector<8x128xf32>
    %10 = tpu.matmul %8, %9, %cst_8 {dimension_numbers = #tpu.dot_dimension_numbers<[1], [0], [0], [1], [0, 0, 1, 1], [], []>} : vector<8x32xbf16>, vector<32x128xbf16>, vector<8x128xf32> -> vector<8x128xf32>
    %c0_9 = arith.constant 0 : index
    %c0_10 = arith.constant 0 : index
    %11 = vector.load %arg5[%c0_9, %c0_10] : memref<1x128xf32, #tpu.memory_space<vmem>>, vector<1x128xf32>
    %12 = vector.broadcast %11 : vector<1x128xf32> to vector<8x128xf32>
    %13 = arith.addf %10, %12 : vector<8x128xf32>
    %14 = arith.negf %13 : vector<8x128xf32>
    %15 = math.exp %14 : vector<8x128xf32>
    %cst_11 = arith.constant 1.000000e+00 : f32
    %16 = vector.broadcast %cst_11 : f32 to vector<8x128xf32>
    %17 = arith.addf %16, %15 : vector<8x128xf32>
    %18 = arith.divf %16, %17 : vector<8x128xf32>
    %c0_12 = arith.constant 0 : index
    %c0_13 = arith.constant 0 : index
    %19 = vector.load %arg6[%c0_12, %c0_13] : memref<8x128xf32, #tpu.memory_space<vmem>>, vector<8x128xf32>
    tpu.vector_store %arg6[%c0_12, %c0_13], %18 {strides = array<i32>} : memref<8x128xf32, #tpu.memory_space<vmem>>, vector<8x128xf32>,
    return
  }
  func.func @transform_0(%arg0: i32) -> (i32, i32) {
    %c0_i32 = arith.constant 0 : i32
    %c0_i32_0 = arith.constant 0 : i32
    return %arg0, %c0_i32 : i32, i32
  }
  func.func @transform_1(%arg0: i32) -> (i32, i32) {
    %c0_i32 = arith.constant 0 : i32
    %c0_i32_0 = arith.constant 0 : i32
    %c0_i32_1 = arith.constant 0 : i32
    return %c0_i32, %c0_i32_0 : i32, i32
  }
  func.func @transform_2(%arg0: i32) -> (i32, i32) {
    %c0_i32 = arith.constant 0 : i32
    %c0_i32_0 = arith.constant 0 : i32
    %c0_i32_1 = arith.constant 0 : i32
    return %c0_i32, %c0_i32_0 : i32, i32
  }
  func.func @transform_3(%arg0: i32) -> (i32, i32) {
    %c0_i32 = arith.constant 0 : i32
    %c0_i32_0 = arith.constant 0 : i32
    %c0_i32_1 = arith.constant 0 : i32
    return %c0_i32, %c0_i32_0 : i32, i32
  }
  func.func @transform_4(%arg0: i32) -> (i32, i32) {
    %c0_i32 = arith.constant 0 : i32
    %c0_i32_0 = arith.constant 0 : i32
    %c0_i32_1 = arith.constant 0 : i32
    return %c0_i32, %c0_i32_0 : i32, i32
  }
  func.func @transform_5(%arg0: i32) -> (i32, i32) {
    %c0_i32 = arith.constant 0 : i32
    %c0_i32_0 = arith.constant 0 : i32
    return %arg0, %c0_i32 : i32, i32
  }
}

</mosaic_0001>

<bundles_post_ra>
// kernel: net_forward.1
= control target key start
LH: loop header
LB: loop body
LE: loop exit
PB: predicated region body
PF: predicated region fallthrough
CT: control target
= control target key end

     0   :  { %10 = vsyncpa [#allocation3], 0  ;;  %s184_s21 = smov [#allocation2]   ;;  %s185_s23 = smov 64   ;;  %s235_s0 = inlined_call_operand.vmem [shape: bf16[8,16], index: 0, kind: input, shape index: {}]   ;;  %s236_s1 = inlined_call_operand.vmem [shape: bf16[16,32], index: 1, kind: input, shape index: {}]   ;;  %s237_s2 = inlined_call_operand.vmem [shape: f32[1,32], index: 2, kind: input, shape index: {}]   ;;  %s238_s3 = inlined_call_operand.hbm [shape: bf16[32,128], index: 3, kind: input, shape index: {}]   ;;  %s239_s4 = inlined_call_operand.vmem [shape: f32[1,128], index: 4, kind: input, shape index: {}]   ;;  %s240_s5 = inlined_call_operand.vmem [shape: f32[8,128], index: 5, kind: output, shape index: {}]  }
   0x1   :  { %s21_s20 = sshll.u32 %s238_s3, 4  ;;  %s23_s22 = sshll.u32 %s184_s21, 4  ;;  %s22_s20 = int_to_ptr.hbm [resolvable:$true] %s21_s20  ;;  %s24_s22 = int_to_ptr.vmem [resolvable:$true] %s23_s22 }
   0x2   :  { %s186_s24 = smov 4  }
   0x3   :  { %29 = dma.hbm_to_vmem [thread:$0]  %s22_s20, 256, %s24_s22, [#allocation3], %s185_s23, %s185_s23, %s186_s24  }
   0x4   :  { %182 = dma.done.wait [#allocation3], 256  }
   0x5   :  { %183 = vsyncadd [#allocation3], 4294967040  ;;  %v146_v0 = vld [vmem:[%s236_s1] sm:$0xff]  ;;  %vm50_vm0 = vcmask 130048   ;;  %v148_v2 = vld [vmem:[#allocation2 + $0x8] sm:$0xff]  ;;  %vm89_vm1 = vcmask 261120  }
   0x6   :  { %61 = vmatpush.bf16.msra.mxu0 %v146_v0  ;;  %v37_v1 = vld [vmem:[%s235_s0] sm:$0xf]  ;;  %99 = vmatpush.bf16.msra.mxu1 %v148_v2 }
   0x7   :  { %v147_v3 = vld [vmem:[#allocation2] sm:$0xff] }
   0x8   :  { %v152_v4 = vld [vmem:[%s237_s2] ss:$0 sm:$0xff] }
   0x9   :  { %135 = vmatmul.msk.bf16.vlgmr.msra.gmra.mxu0 %vm50_vm0, %v37_v1  ;;  %v153_v10 = vld [vmem:[%s239_s4] ss:$0 sm:$0xff] }
   0xa   :  { %100 = vmatpush.bf16.msra.mxu1 %v147_v3 }
  0x86   :  { %v63_v5 = vpop.f32.mrf.mxu0 }
  0x87   :  { %v64_v6 = vadd.f32 %v152_v4, %v63_v5 }
  0x89   :  { %v67_v7 = vmax.f32 %v64_v6, 0.0 }
  0x8b   :  { %v68_v8 = vpack.c.bf16 %v67_v7, %v67_v7 }
  0x8d   :  { %144 = vmatmul.msk.bf16.vlgmr.msra.gmra.mxu1 %vm89_vm1, %v68_v8 }
  0x8e   :  { %v65_v9 = vpop.f32.mrf.mxu0 }
 0x10a   :  { %v102_v11 = vpop.f32.mrf.mxu1 }
 0x10b   :  { %v103_v12 = vadd.f32 %v153_v10, %v102_v11 }
 0x10d   :  { %v145_v13 = vmul.f32 -1.442695, %v103_v12 }
 0x10f   :  { %154 = vpow2.f32 %v145_v13 }
 0x112   :  { %v104_v14 = vpop.f32.mrf.mxu1 }
 0x115   :  { %v155_v15 = vpop.eup %154 }
 0x116   :  { %v109_v16 = vadd.f32 1.0, %v155_v15 }
 0x118   :  { %156 = vrcp.f32 %v109_v16  ;;  %v121_v20 = vand.u32 2147483648, %v109_v16  ;;  %v119_v22 = vand.u32 2147483647, %v109_v16  ;;  %vm115_vm3 = vweird.f32 %v109_v16 }
 0x11a   :  { %v122_v24 = vor.u32 1.1754944e-38, %v121_v20  ;;  %vm120_vm5 = vcmp.eq.f32.partialorder %v119_v22, 8.507059e+37 }
 0x11e   :  { %v157_v17 = vpop.eup %156 }
 0x11f   :  { %v111_v18 = vmul.f32 %v157_v17, %v109_v16  ;;  %vm116_vm2 = vweird.f32 %v157_v17 }
 0x120   :  { %vm117_vm4 = vmor %vm115_vm3, %vm116_vm2 }
 0x121   :  { %v112_v19 = vsub.f32 1.0, %v111_v18 }
 0x123   :  { %v113_v21 = vmul.f32 %v157_v17, %v112_v19 }
 0x125   :  { %v114_v23 = vadd.f32 %v157_v17, %v113_v21 }
 0x127   :  { %v118_v25 = vsel %vm117_vm4, %v157_v17, %v114_v23 }
 0x128   :  { %v123_v26 = vsel %vm120_vm5, %v122_v24, %v118_v25 }
 0x129   :  { %125 = vst [vmem:[%s240_s5] sm:$0xff] %v123_v26 }
 0x12a   :  { %130 = vsyncpa [#allocation3], 1 }

</bundles_post_ra>
